<compile_context>
chip_gen: v7x
topology: tpu7x:2x2x1
jax: 0.10.0
libtpu: 0.0.40
codegen_flags: <defaults>
</compile_context>

<pallas_src>
import math

import numpy as np

import jax
import jax.numpy as jnp
from jax.experimental import pallas as pl
from jax.experimental.pallas import tpu as pltpu


def _plain_jax_dot_decoder(x1: jax.Array, x2: jax.Array) -> jax.Array:
    """Fallback path (no Pallas) for cases the kernel does not cover."""
    if jnp.issubdtype(x1.dtype, jnp.floating):
        out = (x1.astype(jnp.float32) * x2.astype(jnp.float32)).sum(axis=-1)
        return out.astype(x1.dtype).reshape(-1)
    # TODO(synk): integer inputs follow jnp's (not torch's) integer sum
    # promotion rules on this fallback path.
    return (x1 * x2).sum(axis=-1).reshape(-1)


def _vmem_budget():
    """(per-input tile-target bytes, vmem_limit_bytes), tuned per generation."""
    try:
        cap = int(pltpu.get_tpu_info().vmem_capacity_bytes)
    except Exception:
        cap = None
    if cap is not None and cap >= 96 * 1024 * 1024:
        # v5e / v6e (128 MiB physical VMEM): big tiles amortize the ~0.35 us
        # per-grid-step overhead and push toward the HBM roofline.
        return 8 * 1024 * 1024, 64 * 1024 * 1024
    # v7x (64 MiB physical) or unknown: conservative tiles, 32 MiB scoped limit.
    return 2 * 1024 * 1024, 32 * 1024 * 1024


def _select_fold(m: int, h: int):
    """Choose sp (#rows folded per kernel row) and the pack-alignment pad.

    Goals: w = sp*h a multiple of 128 (dense loads) and sp as wide as practical
    (denser output stores), while keeping the SEG matrix / MXU segmented
    reduction cheap and -- in the common case -- requiring no padding at all
    (sp divides m exactly, so the wrapper reshape is free).
    """
    pack_min = 128 // math.gcd(h, 128)        # minimal fold for 128-lane-dense rows
    cap = 64                                   # MXU cost is sp MACs/element; keep <= 64
    while cap > 1 and cap * cap * h * 4 > 512 * 1024:   # keep SEG (sp*h, sp) <= 512 KiB
        cap //= 2
    cap = min(cap, max(m // 8, 1))             # keep >= ~8 packed rows when possible
    divisors = [s for s in range(1, cap + 1) if m % s == 0]
    dense = [s for s in divisors if (s * h) % 128 == 0]
    if dense:
        return max(dense), 0
    if pack_min <= cap:
        # Rare: m is not a multiple of pack_min.  Pad a few (< pack_min) rows so
        # kernel rows stay 128-lane dense; this is the only path that copies.
        return pack_min, (-m) % pack_min
    # Awkward h (e.g. odd h, or tiny m): accept lane-padded rows, still widen
    # the output as much as m's divisors allow.
    return max(divisors), 0


def _make_kernel(use_seg: bool):
    if use_seg:
        def kernel(x1_ref, x2_ref, seg_ref, o_ref):
            # Elementwise product on the VPU, accumulation in f32.
            prod = x1_ref[...].astype(jnp.float32) * x2_ref[...].astype(jnp.float32)
            # Segmented row-sums as one MXU matmul against the resident
            # block-diagonal 0/1 matrix (loaded once for the whole grid).
            sums = jnp.dot(prod, seg_ref[...], preferred_element_type=jnp.float32)
            o_ref[...] = sums.astype(o_ref.dtype)
    else:
        def kernel(x1_ref, x2_ref, o_ref):
            prod = x1_ref[...].astype(jnp.float32) * x2_ref[...].astype(jnp.float32)
            o_ref[...] = jnp.sum(prod, axis=-1, keepdims=True).astype(o_ref.dtype)
    return kernel


def dot_decoder(x1: jax.Array, x2: jax.Array) -> jax.Array:
    """Pallas equivalent of DotDecoder.forward: (x1 * x2).sum(-1).reshape(-1)."""
    assert x1.shape == x2.shape, "x1 and x2 must have identical shapes"
    assert x1.dtype == x2.dtype, "x1 and x2 must have identical dtypes"
    *lead, h = x1.shape
    m = int(np.prod(lead, dtype=np.int64)) if lead else 1
    out_dtype = x1.dtype

    if m == 0 or h == 0:
        return jnp.zeros((m,), dtype=out_dtype)
    if not jnp.issubdtype(out_dtype, jnp.floating):
        # TODO(synk): torch's integer sum promotion has no clean f32-accumulate
        # equivalent here; keep integer dtypes on the plain-JAX path.
        return _plain_jax_dot_decoder(x1, x2)

    # ---- fold selection (lane packing) --------------------------------------
    sp, pad = _select_fold(m, h)
    w = sp * h                      # packed kernel-row width
    m_eff = m + pad
    rows = m_eff // sp              # packed rows

    # ---- generation-portable tile sizing ------------------------------------
    tile_bytes, vmem_limit = _vmem_budget()
    itemsize = jnp.dtype(out_dtype).itemsize
    sub = max(8, 32 // itemsize)    # native sublane packing: 8 f32 / 16 bf16 / 32 int8
    budget = vmem_limit // 2        # leave headroom for Mosaic internal scratch
    # Per packed row: 2 inputs x 2 buffers, plus the lane-padded (to 128)
    # double-buffered output block -- counted explicitly per the review.
    row_cost = 2 * 2 * w * itemsize + 2 * 128 * itemsize
    if sub * row_cost > budget:
        # TODO(synk): extremely large hidden dims need a second "arbitrary"
        # grid axis over the feature dim with an f32 accumulator; fall back.
        return _plain_jax_dot_decoder(x1, x2)

    bm = max(1, min(tile_bytes // (w * itemsize), budget // row_cost))
    bm = max(sub, (bm // sub) * sub)
    if bm >= rows:
        if rows >= 2 * sub:
            # Keep >= 2 tiles so the "parallel" axis can split across both
            # TensorCores on v7x (harmless elsewhere).
            half = (rows + 1) // 2
            bm = ((half + sub - 1) // sub) * sub
        else:
            bm = rows               # single block == full array dims (legal)
    num_tiles = pl.cdiv(rows, bm)   # ragged final block handled by Pallas

    # ---- wrapper glue: flatten + fold sp rows per kernel row (free reshape) --
    x1_2d = x1.reshape(m, h)
    x2_2d = x2.reshape(m, h)
    if pad:
        # <= sp-1 rows; zero rows give zero dot products and are sliced off below.
        x1_2d = jnp.pad(x1_2d, ((0, pad), (0, 0)))
        x2_2d = jnp.pad(x2_2d, ((0, pad), (0, 0)))
    x1_p = x1_2d.reshape(rows, w)
    x2_p = x2_2d.reshape(rows, w)

    use_seg = sp > 1
    inputs = [x1_p, x2_p]
    in_specs = [
        pl.BlockSpec((bm, w), lambda i: (i, 0)),
        pl.BlockSpec((bm, w), lambda i: (i, 0)),
    ]
    if use_seg:
        # Block-diagonal 0/1 segment matrix, built once on the host.
        seg_np = np.zeros((w, sp), dtype=np.float32)
        for j in range(sp):
            seg_np[j * h:(j + 1) * h, j] = 1.0
        inputs.append(jnp.asarray(seg_np))
        # Constant block index -> loaded once, stays resident across the grid.
        in_specs.append(pl.BlockSpec((w, sp), lambda i: (0, 0)))

    out_2d = pl.pallas_call(
        _make_kernel(use_seg),
        out_shape=jax.ShapeDtypeStruct((rows, sp), out_dtype),
        grid_spec=pltpu.PrefetchScalarGridSpec(
            num_scalar_prefetch=0,
            grid=(num_tiles,),
            in_specs=in_specs,
            out_specs=pl.BlockSpec((bm, sp), lambda i: (i, 0)),
        ),
        compiler_params=pltpu.CompilerParams(
            dimension_semantics=("parallel",),
            vmem_limit_bytes=vmem_limit,
        ),
    )(*inputs)

    # Row-major flatten of (rows, sp) restores the original row order.
    out_flat = out_2d.reshape(-1)
    if pad:
        out_flat = out_flat[:m]
    return out_flat


if __name__ == "__main__":
    key = jax.random.PRNGKey(0)
    k1, k2, k3, k4 = jax.random.split(key, 4)

    # Primary check: shapes consistent with the module (batch=2, seq=8, hidden=32).
    x1 = jax.random.normal(k1, (2, 8, 32), dtype=jnp.float32)
    x2 = jax.random.normal(k2, (2, 8, 32), dtype=jnp.float32)
    out = jax.block_until_ready(dot_decoder(x1, x2))
    ref = (x1 * x2).sum(axis=-1).reshape(-1)
    assert out.shape == ref.shape == (16,)
    assert jnp.allclose(out, ref, atol=1e-5, rtol=1e-5)

    # Secondary check: exercises the h % 128 == 0 path (looser tol for MXU accum).
    y1 = jax.random.normal(k3, (2, 8, 128), dtype=jnp.float32)
    y2 = jax.random.normal(k4, (2, 8, 128), dtype=jnp.float32)
    out2 = jax.block_until_ready(dot_decoder(y1, y2))
    ref2 = (y1 * y2).sum(axis=-1).reshape(-1)
    assert out2.shape == ref2.shape == (16,)
    assert jnp.allclose(out2, ref2, atol=1e-2, rtol=1e-2)

    print("KERNEL_OK")
</pallas_src>

<mosaic_0001>
module attributes {stable_mosaic.version = 11 : i64} {
  func.func @kernel(%arg0: i32, %arg1: memref<8x64xf32, #tpu.memory_space<vmem>>, %arg2: memref<8x64xf32, #tpu.memory_space<vmem>>, %arg3: memref<64x2xf32, #tpu.memory_space<vmem>>, %arg4: memref<8x2xf32, #tpu.memory_space<vmem>>) attributes {dimension_semantics = [#tpu.dimension_semantics<parallel>], iteration_bounds = array<i64: 1>, scalar_prefetch = 0 : i64, scratch_operands = 0 : i64, tpu.core_type = #tpu.core_type<tc>, window_params = [{transform_indices = @transform_0, window_bounds = array<i64: 8, 64>}, {transform_indices = @transform_1, window_bounds = array<i64: 8, 64>}, {pipeline_mode = #tpu.pipeline_mode<synchronous>, transform_indices = @transform_2, window_bounds = array<i64: 64, 2>}, {transform_indices = @transform_3, window_bounds = array<i64: 8, 2>}]} {
    %c0 = arith.constant 0 : index
    %c0_0 = arith.constant 0 : index
    %0 = vector.load %arg1[%c0, %c0_0] : memref<8x64xf32, #tpu.memory_space<vmem>>, vector<8x64xf32>
    %c0_1 = arith.constant 0 : index
    %c0_2 = arith.constant 0 : index
    %1 = vector.load %arg2[%c0_1, %c0_2] : memref<8x64xf32, #tpu.memory_space<vmem>>, vector<8x64xf32>
    %2 = arith.mulf %0, %1 : vector<8x64xf32>
    %c0_3 = arith.constant 0 : index
    %c0_4 = arith.constant 0 : index
    %3 = vector.load %arg3[%c0_3, %c0_4] : memref<64x2xf32, #tpu.memory_space<vmem>>, vector<64x2xf32>
    %cst = arith.constant dense<0.000000e+00> : vector<8x2xf32>
    %4 = tpu.matmul %2, %3, %cst {dimension_numbers = #tpu.dot_dimension_numbers<[1], [0], [0], [1], [0, 0, 1, 1], [], []>} : vector<8x64xf32>, vector<64x2xf32>, vector<8x2xf32> -> vector<8x2xf32>
    %c0_5 = arith.constant 0 : index
    %c0_6 = arith.constant 0 : index
    %5 = vector.load %arg4[%c0_5, %c0_6] : memref<8x2xf32, #tpu.memory_space<vmem>>, vector<8x2xf32>
    tpu.vector_store %arg4[%c0_5, %c0_6], %4 {strides = array<i32>} : memref<8x2xf32, #tpu.memory_space<vmem>>, vector<8x2xf32>,
    return
  }
  func.func @transform_0(%arg0: i32) -> (i32, i32) {
    %c0_i32 = arith.constant 0 : i32
    %c0_i32_0 = arith.constant 0 : i32
    return %arg0, %c0_i32 : i32, i32
  }
  func.func @transform_1(%arg0: i32) -> (i32, i32) {
    %c0_i32 = arith.constant 0 : i32
    %c0_i32_0 = arith.constant 0 : i32
    return %arg0, %c0_i32 : i32, i32
  }
  func.func @transform_2(%arg0: i32) -> (i32, i32) {
    %c0_i32 = arith.constant 0 : i32
    %c0_i32_0 = arith.constant 0 : i32
    %c0_i32_1 = arith.constant 0 : i32
    return %c0_i32, %c0_i32_0 : i32, i32
  }
  func.func @transform_3(%arg0: i32) -> (i32, i32) {
    %c0_i32 = arith.constant 0 : i32
    %c0_i32_0 = arith.constant 0 : i32
    return %arg0, %c0_i32 : i32, i32
  }
}

</mosaic_0001>

<bundles_post_ra>
// kernel: tpu_custom_call.1
= control target key start
LH: loop header
LB: loop body
LE: loop exit
PB: predicated region body
PF: predicated region fallthrough
CT: control target
= control target key end

     0   :  { %v149_v0 = vmov 0.0|0.0   ;;  %vm150_vm0 = vmmov 0   ;;  %v151_v4 = vmov 0.0   ;;  %vm25_vm1 = vcmask 523264   ;;  %s205_s2 = inlined_call_operand.vmem [shape: f32[64,2], index: 2, kind: input, shape index: {}]   ;;  %s206_s0 = inlined_call_operand.vmem [shape: f32[8,64], index: 0, kind: input, shape index: {}]   ;;  %s207_s1 = inlined_call_operand.vmem [shape: f32[8,64], index: 1, kind: input, shape index: {}]   ;;  %s208_s3 = inlined_call_operand.vmem [shape: f32[8,2], index: 3, kind: output, shape index: {}]  }
   0x1   :  { %134 = vmatprep.subr.bf16.mxu0 %v149_v0  ;;  %v17_v1 = vld [vmem:[%s205_s2] sm:$0xff]  ;;  %v18_v2 = vld [vmem:[%s205_s2 + $0x8] sm:$0xff]  ;;  %v19_v3 = vld [vmem:[%s205_s2 + $0x10] sm:$0xff]  ;;  %131 = vmatprep.mubr.msk.f32.mxu0 %vm150_vm0, %v151_v4  ;;  %vm99_vm2 = vcmask 15360  }
   0x2   :  { %v135_v5 = vpack.c.bf16 %v18_v2, %v17_v1  ;;  %v20_v6 = vld [vmem:[%s205_s2 + $0x18] sm:$0xff]  ;;  %v21_v8 = vld [vmem:[%s205_s2 + $0x20] sm:$0xff]  ;;  %v22_v9 = vld [vmem:[%s205_s2 + $0x28] sm:$0xff] }
   0x3   :  { %v138_v7 = vpack.c.bf16 %v20_v6, %v19_v3  ;;  %v141_v10 = vpack.c.bf16 %v22_v9, %v21_v8  ;;  %v23_v11 = vld [vmem:[%s205_s2 + $0x30] sm:$0xff]  ;;  %v24_v12 = vld [vmem:[%s205_s2 + $0x38] sm:$0xff]  ;;  %v14_v14 = vld [vmem:[%s206_s0] sm:$0xff] }
   0x4   :  { %136 = vmatpush3.bf16.msra.mxu0 %v135_v5  ;;  %v144_v13 = vpack.c.bf16 %v24_v12, %v23_v11  ;;  %v15_v15 = vld [vmem:[%s207_s1] sm:$0xff] }
   0x5   :  { %137 = vmatprep.subr.bf16.mxu0 %v149_v0  ;;  %v16_v16 = vmul.f32 %v15_v15, %v14_v14 }
   0x8   :  { %139 = vmatpush3.bf16.msra.mxu0 %v138_v7 }
   0x9   :  { %140 = vmatprep.subr.bf16.mxu0 %v149_v0 }
   0xc   :  { %142 = vmatpush3.bf16.msra.mxu0 %v141_v10 }
   0xd   :  { %143 = vmatprep.subr.bf16.mxu0 %v149_v0 }
  0x10   :  { %145 = vmatpush3.bf16.msra.mxu0 %v144_v13 }
  0x13   :  { %132 = vmatmul.mubr.msk.f32.vlgmr.msra.gmra.mrb[0].mxu0 %vm25_vm1, %v16_v16 }
  0xe6   :  { %v95_v17 = vpop.f32.mrb[0].mxu0 }
  0xe7   :  { %100 = vst.msk [vmem:[%s208_s3] sm:$0xff] %vm99_vm2, %v95_v17  ;;  %v133_v18 = vpop.f32.mrb[1].mxu0 }

</bundles_post_ra>
